<compile_context>
chip_gen: v6e
topology: v6e:2x2x1
jax: 0.10.0
libtpu: 0.0.40
codegen_flags: <defaults>
</compile_context>

<pallas_src>
import jax
import jax.numpy as jnp
from jax import lax
from jax.experimental import pallas as pl
from jax.experimental.pallas import tpu as pltpu

LANES = 128


def _elu(x):
    # F.elu (alpha=1); exp runs on the clamped negative branch (EUP slot, f32).
    return jnp.where(x > 0, x, jnp.exp(jnp.minimum(x, 0.0)) - 1.0)


def _round_up(v, m):
    return (v + m - 1) // m * m


# ---------------- single fused forward kernel (factory) ----------------------
def _make_fused_kernel(offs, n, n_fts, h1, h2, n_edges, rows_out, lambda_1):
    ox, oa, oe1, oe2, od1, od2, ow = offs

    def kernel(s_ref, r_ref, packed_ref, out_ref):
        # ---- static (zero-cost) slices out of the packed input slab ----
        x   = packed_ref[ox:ox + n,       0:n_fts]
        a   = packed_ref[oa:oa + n,       0:n]
        we1 = packed_ref[oe1:oe1 + n_fts, 0:h1]
        we2 = packed_ref[oe2:oe2 + h1,    0:h2]
        wd1 = packed_ref[od1:od1 + h2,    0:h1]
        wd2 = packed_ref[od2:od2 + h1,    0:n_fts]
        w   = packed_ref[ow:ow + n,       0:n]

        def gcn(h_in, wt):
            t = jnp.dot(h_in, wt, preferred_element_type=jnp.float32)
            return _elu(jnp.dot(a, t, preferred_element_type=jnp.float32))

        # ---- encoder ----
        h1v = gcn(x, we1)
        h = gcn(h1v, we2)                        # self.H  (n, h2)

        # H rows, zero-padded to 128 lanes, written with one unmasked store.
        h_pad = jnp.concatenate(
            [h, jnp.zeros((n, LANES - h2), jnp.float32)], axis=1)
        out_ref[0:n, :] = h_pad

        # ---- structure loss: scalar-indexed edge gather from SMEM indices ----
        def edge_body(i, acc):
            s = s_ref[i]
            r = r_ref[i]
            hs = out_ref[pl.ds(s, 1), :]          # (1, 128), lanes >= h2 are 0
            hr = out_ref[pl.ds(r, 1), :]
            z = jnp.sum(hs * hr)
            # -log(sigmoid(z)) == softplus(-z), numerically stable form.
            return acc + jnp.maximum(-z, 0.0) + jnp.log1p(jnp.exp(-jnp.abs(z)))

        st = lax.fori_loop(0, n_edges, edge_body, jnp.float32(0.0),
                           unroll=True)

        # ---- self-expression: coef = weight - diag(diag(weight)) ----
        ii = lax.broadcasted_iota(jnp.int32, (n, n), 0)
        jj = lax.broadcasted_iota(jnp.int32, (n, n), 1)
        coef = jnp.where(ii == jj, 0.0, w)
        hc = jnp.dot(coef, h, preferred_element_type=jnp.float32)  # self.HC
        c_reg = jnp.sum(jnp.abs(coef))                             # C_Regular

        # ---- decoder ----
        d1 = gcn(hc, wd1)
        x_rec = gcn(d1, wd2)

        # ---- reconstruction / self-expression losses ----
        dx = x - x_rec
        ft = jnp.mean(dx * dx)
        dh = h - hc
        se = 0.5 * jnp.mean(dh * dh)

        loss = ft + lambda_1 * st + se + c_reg

        # ---- scalar row packed lane-dense into the tail block of the output --
        rows_tail = rows_out - n
        row = lax.broadcasted_iota(jnp.int32, (rows_tail, LANES), 0)
        lane = lax.broadcasted_iota(jnp.int32, (rows_tail, LANES), 1)
        scal = jnp.where((row == 0) & (lane == 0), ft, 0.0)
        scal = jnp.where((row == 0) & (lane == 1), st, scal)
        scal = jnp.where((row == 0) & (lane == 2), se, scal)
        scal = jnp.where((row == 0) & (lane == 3), c_reg, scal)
        scal = jnp.where((row == 0) & (lane == 4), loss, scal)
        out_ref[n:rows_out, :] = scal

    return kernel


# ---------------- module forward --------------------------------------------
def individual_mlp_encoder_forward(params, X, A, S, R, lambda_1):
    n, n_fts = X.shape
    h1 = params["W_enc1"].shape[1]
    h2 = params["W_enc2"].shape[1]
    n_edges = S.shape[0]

    # ---- pack all dense operands into one lane-dense f32 slab ----
    mats = [X, A, params["W_enc1"], params["W_enc2"],
            params["W_dec1"], params["W_dec2"], params["weight"]]
    padded, offs = [], []
    off = 0
    for m in mats:
        r, c = m.shape
        rp = _round_up(r, 8)
        offs.append(off)
        padded.append(jnp.pad(m.astype(jnp.float32),
                              ((0, rp - r), (0, LANES - c))))
        off += rp
    packed = jnp.concatenate(padded, axis=0)          # (rows_in, 128)
    rows_in = packed.shape[0]

    rows_out = _round_up(n + 1, 8)                    # H rows + 1 scalar row

    s_idx = S.astype(jnp.int32).reshape(n_edges)
    r_idx = R.astype(jnp.int32).reshape(n_edges)

    kernel = _make_fused_kernel(tuple(offs), n, n_fts, h1, h2,
                                n_edges, rows_out, float(lambda_1))

    # Advisory cost estimate so XLA can schedule around the custom call.
    flops = 2 * (n * n_fts * h1 + n * n * h1          # enc1
                 + n * h1 * h2 + n * n * h2           # enc2
                 + n * n * h2                         # coef @ H
                 + n * h2 * h1 + n * n * h1           # dec1
                 + n * h1 * n_fts + n * n * n_fts     # dec2
                 + n_edges * h2)                      # edge dot products
    transcendentals = n * (2 * h1 + h2 + n_fts) + 2 * n_edges
    bytes_accessed = 4 * (rows_in * LANES + rows_out * LANES + 2 * n_edges)

    out = pl.pallas_call(
        kernel,
        grid_spec=pltpu.PrefetchScalarGridSpec(
            num_scalar_prefetch=2,                    # S, R -> SMEM
            grid=(1,),
            in_specs=[pl.BlockSpec((rows_in, LANES), lambda i, s, r: (0, 0))],
            out_specs=pl.BlockSpec((rows_out, LANES), lambda i, s, r: (0, 0)),
        ),
        out_shape=jax.ShapeDtypeStruct((rows_out, LANES), jnp.float32),
        compiler_params=pltpu.CompilerParams(
            dimension_semantics=("arbitrary",)),
        cost_estimate=pl.CostEstimate(flops=flops,
                                      transcendentals=transcendentals,
                                      bytes_accessed=bytes_accessed),
    )(s_idx, r_idx, packed)

    H = out[:n, :h2]
    ft = out[n, 0]
    st = out[n, 1]
    se = out[n, 2]
    c_reg = out[n, 3]
    loss = out[n, 4]
    return H, loss, ft, st, se, c_reg


# ---------------- deterministic parameter init -------------------------------
def xavier_uniform(key, fan_in, fan_out, gain):
    a = gain * jnp.sqrt(6.0 / (fan_in + fan_out))
    return jax.random.uniform(key, (fan_in, fan_out), jnp.float32, -a, a)


def init_params(key, n_fts, hidden1, hidden2, n_nodes):
    gain = jnp.sqrt(2.0)
    k1, k2, k3, k4 = jax.random.split(key, 4)
    return {
        "W_enc1": xavier_uniform(k1, n_fts, hidden1, gain),
        "W_enc2": xavier_uniform(k2, hidden1, hidden2, gain),
        "W_dec1": xavier_uniform(k3, hidden2, hidden1, gain),
        "W_dec2": xavier_uniform(k4, hidden1, n_fts, gain),
        "weight": 0.0001 * jnp.ones((n_nodes, n_nodes), jnp.float32),
    }


if __name__ == "__main__":
    n_nodes, n_fts, hidden1, hidden2, n_edges = 16, 32, 32, 16, 8
    lambda_1 = 0.1

    key = jax.random.PRNGKey(0)
    kp, kx, ka, ks, kr = jax.random.split(key, 5)

    params = init_params(kp, n_fts, hidden1, hidden2, n_nodes)

    X = jax.random.normal(kx, (n_nodes, n_fts), jnp.float32)

    # symmetric random adjacency with self loops, row-normalized (dense)
    A_raw = (jax.random.uniform(ka, (n_nodes, n_nodes)) < 0.25).astype(jnp.float32)
    A_sym = jnp.clip(A_raw + A_raw.T + jnp.eye(n_nodes, dtype=jnp.float32), 0.0, 1.0)
    A = A_sym / jnp.sum(A_sym, axis=1, keepdims=True)

    S = jax.random.randint(ks, (n_edges,), 0, n_nodes, jnp.int32)
    R = jax.random.randint(kr, (n_edges,), 0, n_nodes, jnp.int32)

    H, loss, ft, st, se, c_reg = individual_mlp_encoder_forward(
        params, X, A, S, R, lambda_1)
    jax.block_until_ready((H, loss, ft, st, se, c_reg))
    print("KERNEL_OK")
</pallas_src>

<mosaic_0001>
module attributes {stable_mosaic.version = 11 : i64} {
  func.func @kernel(%arg0: i32, %arg1: memref<8xi32, #tpu.memory_space<smem>>, %arg2: memref<8xi32, #tpu.memory_space<smem>>, %arg3: memref<160x128xf32, #tpu.memory_space<vmem>>, %arg4: memref<24x128xf32, #tpu.memory_space<vmem>>) attributes {dimension_semantics = [#tpu.dimension_semantics<arbitrary>], iteration_bounds = array<i64: 1>, scalar_prefetch = 2 : i64, scratch_operands = 0 : i64, tpu.core_type = #tpu.core_type<tc>, window_params = [{pipeline_mode = #tpu.pipeline_mode<synchronous>, transform_indices = @transform_0, window_bounds = array<i64: 160, 128>}, {pipeline_mode = #tpu.pipeline_mode<synchronous>, transform_indices = @transform_1, window_bounds = array<i64: 24, 128>}]} {
    %c0 = arith.constant 0 : index
    %c0_0 = arith.constant 0 : index
    %0 = vector.load %arg3[%c0, %c0_0] : memref<160x128xf32, #tpu.memory_space<vmem>>, vector<16x32xf32>
    %c16 = arith.constant 16 : index
    %c0_1 = arith.constant 0 : index
    %1 = vector.load %arg3[%c16, %c0_1] : memref<160x128xf32, #tpu.memory_space<vmem>>, vector<16x16xf32>
    %c32 = arith.constant 32 : index
    %c0_2 = arith.constant 0 : index
    %2 = vector.load %arg3[%c32, %c0_2] : memref<160x128xf32, #tpu.memory_space<vmem>>, vector<32x32xf32>
    %c64 = arith.constant 64 : index
    %c0_3 = arith.constant 0 : index
    %3 = vector.load %arg3[%c64, %c0_3] : memref<160x128xf32, #tpu.memory_space<vmem>>, vector<32x16xf32>
    %c96 = arith.constant 96 : index
    %c0_4 = arith.constant 0 : index
    %4 = vector.load %arg3[%c96, %c0_4] : memref<160x128xf32, #tpu.memory_space<vmem>>, vector<16x32xf32>
    %c112 = arith.constant 112 : index
    %c0_5 = arith.constant 0 : index
    %5 = vector.load %arg3[%c112, %c0_5] : memref<160x128xf32, #tpu.memory_space<vmem>>, vector<32x32xf32>
    %c144 = arith.constant 144 : index
    %c0_6 = arith.constant 0 : index
    %6 = vector.load %arg3[%c144, %c0_6] : memref<160x128xf32, #tpu.memory_space<vmem>>, vector<16x16xf32>
    %cst = arith.constant dense<0.000000e+00> : vector<16x32xf32>
    %7 = tpu.matmul %0, %2, %cst {dimension_numbers = #tpu.dot_dimension_numbers<[1], [0], [0], [1], [0, 0, 1, 1], [], []>} : vector<16x32xf32>, vector<32x32xf32>, vector<16x32xf32> -> vector<16x32xf32>
    %cst_7 = arith.constant dense<0.000000e+00> : vector<16x32xf32>
    %8 = tpu.matmul %1, %7, %cst_7 {dimension_numbers = #tpu.dot_dimension_numbers<[1], [0], [0], [1], [0, 0, 1, 1], [], []>} : vector<16x16xf32>, vector<16x32xf32>, vector<16x32xf32> -> vector<16x32xf32>
    %cst_8 = arith.constant 0.000000e+00 : f32
    %9 = vector.broadcast %cst_8 : f32 to vector<16x32xf32>
    %10 = arith.cmpf ogt, %8, %9 : vector<16x32xf32>
    %cst_9 = arith.constant 0.000000e+00 : f32
    %11 = vector.broadcast %cst_9 : f32 to vector<16x32xf32>
    %12 = arith.minimumf %8, %11 : vector<16x32xf32>
    %13 = math.exp %12 : vector<16x32xf32>
    %cst_10 = arith.constant 1.000000e+00 : f32
    %14 = vector.broadcast %cst_10 : f32 to vector<16x32xf32>
    %15 = arith.subf %13, %14 : vector<16x32xf32>
    %16 = arith.select %10, %8, %15 : vector<16x32xi1>, vector<16x32xf32>
    %cst_11 = arith.constant dense<0.000000e+00> : vector<16x16xf32>
    %17 = tpu.matmul %16, %3, %cst_11 {dimension_numbers = #tpu.dot_dimension_numbers<[1], [0], [0], [1], [0, 0, 1, 1], [], []>} : vector<16x32xf32>, vector<32x16xf32>, vector<16x16xf32> -> vector<16x16xf32>
    %cst_12 = arith.constant dense<0.000000e+00> : vector<16x16xf32>
    %18 = tpu.matmul %1, %17, %cst_12 {dimension_numbers = #tpu.dot_dimension_numbers<[1], [0], [0], [1], [0, 0, 1, 1], [], []>} : vector<16x16xf32>, vector<16x16xf32>, vector<16x16xf32> -> vector<16x16xf32>
    %cst_13 = arith.constant 0.000000e+00 : f32
    %19 = vector.broadcast %cst_13 : f32 to vector<16x16xf32>
    %20 = arith.cmpf ogt, %18, %19 : vector<16x16xf32>
    %cst_14 = arith.constant 0.000000e+00 : f32
    %21 = vector.broadcast %cst_14 : f32 to vector<16x16xf32>
    %22 = arith.minimumf %18, %21 : vector<16x16xf32>
    %23 = math.exp %22 : vector<16x16xf32>
    %cst_15 = arith.constant 1.000000e+00 : f32
    %24 = vector.broadcast %cst_15 : f32 to vector<16x16xf32>
    %25 = arith.subf %23, %24 : vector<16x16xf32>
    %26 = arith.select %20, %18, %25 : vector<16x16xi1>, vector<16x16xf32>
    %cst_16 = arith.constant 0.000000e+00 : f32
    %27 = vector.broadcast %cst_16 : f32 to vector<16x112xf32>
    %28 = tpu.concatenate %26, %27 in 1 : vector<16x16xf32>, vector<16x112xf32> -> vector<16x128xf32>
    %c0_17 = arith.constant 0 : index
    %c0_18 = arith.constant 0 : index
    %29 = vector.load %arg4[%c0_17, %c0_18] : memref<24x128xf32, #tpu.memory_space<vmem>>, vector<16x128xf32>
    tpu.vector_store %arg4[%c0_17, %c0_18], %28 {strides = array<i32>} : memref<24x128xf32, #tpu.memory_space<vmem>>, vector<16x128xf32>,
    %cst_19 = arith.constant 0.000000e+00 : f32
    %c0_i32 = arith.constant 0 : i32
    %30 = arith.index_cast %c0_i32 : i32 to index
    %31 = memref.load %arg1[%30] : memref<8xi32, #tpu.memory_space<smem>>
    %32 = arith.index_cast %c0_i32 : i32 to index
    %33 = memref.load %arg2[%32] : memref<8xi32, #tpu.memory_space<smem>>
    %34 = arith.index_cast %31 : i32 to index
    %c0_20 = arith.constant 0 : index
    %35 = vector.load %arg4[%34, %c0_20] : memref<24x128xf32, #tpu.memory_space<vmem>>, vector<1x128xf32>
    %36 = arith.index_cast %33 : i32 to index
    %c0_21 = arith.constant 0 : index
    %37 = vector.load %arg4[%36, %c0_21] : memref<24x128xf32, #tpu.memory_space<vmem>>, vector<1x128xf32>
    %38 = arith.mulf %35, %37 : vector<1x128xf32>
    %39 = vector.shape_cast %38 : vector<1x128xf32> to vector<1x1x128xf32>
    %cst_22 = arith.constant dense<0.000000e+00> : vector<1xf32>
    %40 = vector.multi_reduction <add>, %39, %cst_22 [1, 2] : vector<1x1x128xf32> to vector<1xf32>
    %41 = vector.shape_cast %40 : vector<1xf32> to vector<1x1x1xf32>
    %42 = vector.extract %41[0, 0, 0] : f32 from vector<1x1x1xf32>
    %cst_23 = arith.constant 0.000000e+00 : f32
    %43 = arith.subf %cst_23, %42 : f32
    %cst_24 = arith.constant 0.000000e+00 : f32
    %44 = arith.maximumf %43, %cst_24 : f32
    %45 = arith.addf %cst_19, %44 : f32
    %46 = math.absf %42 : f32
    %cst_25 = arith.constant 0.000000e+00 : f32
    %47 = arith.subf %cst_25, %46 : f32
    %48 = math.exp %47 : f32
    %49 = math.log1p %48 : f32
    %50 = arith.addf %45, %49 : f32
    %c1_i32 = arith.constant 1 : i32
    %51 = arith.index_cast %c1_i32 : i32 to index
    %52 = memref.load %arg1[%51] : memref<8xi32, #tpu.memory_space<smem>>
    %53 = arith.index_cast %c1_i32 : i32 to index
    %54 = memref.load %arg2[%53] : memref<8xi32, #tpu.memory_space<smem>>
    %55 = arith.index_cast %52 : i32 to index
    %c0_26 = arith.constant 0 : index
    %56 = vector.load %arg4[%55, %c0_26] : memref<24x128xf32, #tpu.memory_space<vmem>>, vector<1x128xf32>
    %57 = arith.index_cast %54 : i32 to index
    %c0_27 = arith.constant 0 : index
    %58 = vector.load %arg4[%57, %c0_27] : memref<24x128xf32, #tpu.memory_space<vmem>>, vector<1x128xf32>
    %59 = arith.mulf %56, %58 : vector<1x128xf32>
    %60 = vector.shape_cast %59 : vector<1x128xf32> to vector<1x1x128xf32>
    %cst_28 = arith.constant dense<0.000000e+00> : vector<1xf32>
    %61 = vector.multi_reduction <add>, %60, %cst_28 [1, 2] : vector<1x1x128xf32> to vector<1xf32>
    %62 = vector.shape_cast %61 : vector<1xf32> to vector<1x1x1xf32>
    %63 = vector.extract %62[0, 0, 0] : f32 from vector<1x1x1xf32>
    %cst_29 = arith.constant 0.000000e+00 : f32
    %64 = arith.subf %cst_29, %63 : f32
    %cst_30 = arith.constant 0.000000e+00 : f32
    %65 = arith.maximumf %64, %cst_30 : f32
    %66 = arith.addf %50, %65 : f32
    %67 = math.absf %63 : f32
    %cst_31 = arith.constant 0.000000e+00 : f32
    %68 = arith.subf %cst_31, %67 : f32
    %69 = math.exp %68 : f32
    %70 = math.log1p %69 : f32
    %71 = arith.addf %66, %70 : f32
    %c2_i32 = arith.constant 2 : i32
    %72 = arith.index_cast %c2_i32 : i32 to index
    %73 = memref.load %arg1[%72] : memref<8xi32, #tpu.memory_space<smem>>
    %74 = arith.index_cast %c2_i32 : i32 to index
    %75 = memref.load %arg2[%74] : memref<8xi32, #tpu.memory_space<smem>>
    %76 = arith.index_cast %73 : i32 to index
    %c0_32 = arith.constant 0 : index
    %77 = vector.load %arg4[%76, %c0_32] : memref<24x128xf32, #tpu.memory_space<vmem>>, vector<1x128xf32>
    %78 = arith.index_cast %75 : i32 to index
    %c0_33 = arith.constant 0 : index
    %79 = vector.load %arg4[%78, %c0_33] : memref<24x128xf32, #tpu.memory_space<vmem>>, vector<1x128xf32>
    %80 = arith.mulf %77, %79 : vector<1x128xf32>
    %81 = vector.shape_cast %80 : vector<1x128xf32> to vector<1x1x128xf32>
    %cst_34 = arith.constant dense<0.000000e+00> : vector<1xf32>
    %82 = vector.multi_reduction <add>, %81, %cst_34 [1, 2] : vector<1x1x128xf32> to vector<1xf32>
    %83 = vector.shape_cast %82 : vector<1xf32> to vector<1x1x1xf32>
    %84 = vector.extract %83[0, 0, 0] : f32 from vector<1x1x1xf32>
    %cst_35 = arith.constant 0.000000e+00 : f32
    %85 = arith.subf %cst_35, %84 : f32
    %cst_36 = arith.constant 0.000000e+00 : f32
    %86 = arith.maximumf %85, %cst_36 : f32
    %87 = arith.addf %71, %86 : f32
    %88 = math.absf %84 : f32
    %cst_37 = arith.constant 0.000000e+00 : f32
    %89 = arith.subf %cst_37, %88 : f32
    %90 = math.exp %89 : f32
    %91 = math.log1p %90 : f32
    %92 = arith.addf %87, %91 : f32
    %c3_i32 = arith.constant 3 : i32
    %93 = arith.index_cast %c3_i32 : i32 to index
    %94 = memref.load %arg1[%93] : memref<8xi32, #tpu.memory_space<smem>>
    %95 = arith.index_cast %c3_i32 : i32 to index
    %96 = memref.load %arg2[%95] : memref<8xi32, #tpu.memory_space<smem>>
    %97 = arith.index_cast %94 : i32 to index
    %c0_38 = arith.constant 0 : index
    %98 = vector.load %arg4[%97, %c0_38] : memref<24x128xf32, #tpu.memory_space<vmem>>, vector<1x128xf32>
    %99 = arith.index_cast %96 : i32 to index
    %c0_39 = arith.constant 0 : index
    %100 = vector.load %arg4[%99, %c0_39] : memref<24x128xf32, #tpu.memory_space<vmem>>, vector<1x128xf32>
    %101 = arith.mulf %98, %100 : vector<1x128xf32>
    %102 = vector.shape_cast %101 : vector<1x128xf32> to vector<1x1x128xf32>
    %cst_40 = arith.constant dense<0.000000e+00> : vector<1xf32>
    %103 = vector.multi_reduction <add>, %102, %cst_40 [1, 2] : vector<1x1x128xf32> to vector<1xf32>
    %104 = vector.shape_cast %103 : vector<1xf32> to vector<1x1x1xf32>
    %105 = vector.extract %104[0, 0, 0] : f32 from vector<1x1x1xf32>
    %cst_41 = arith.constant 0.000000e+00 : f32
    %106 = arith.subf %cst_41, %105 : f32
    %cst_42 = arith.constant 0.000000e+00 : f32
    %107 = arith.maximumf %106, %cst_42 : f32
    %108 = arith.addf %92, %107 : f32
    %109 = math.absf %105 : f32
    %cst_43 = arith.constant 0.000000e+00 : f32
    %110 = arith.subf %cst_43, %109 : f32
    %111 = math.exp %110 : f32
    %112 = math.log1p %111 : f32
    %113 = arith.addf %108, %112 : f32
    %c4_i32 = arith.constant 4 : i32
    %114 = arith.index_cast %c4_i32 : i32 to index
    %115 = memref.load %arg1[%114] : memref<8xi32, #tpu.memory_space<smem>>
    %116 = arith.index_cast %c4_i32 : i32 to index
    %117 = memref.load %arg2[%116] : memref<8xi32, #tpu.memory_space<smem>>
    %118 = arith.index_cast %115 : i32 to index
    %c0_44 = arith.constant 0 : index
    %119 = vector.load %arg4[%118, %c0_44] : memref<24x128xf32, #tpu.memory_space<vmem>>, vector<1x128xf32>
    %120 = arith.index_cast %117 : i32 to index
    %c0_45 = arith.constant 0 : index
    %121 = vector.load %arg4[%120, %c0_45] : memref<24x128xf32, #tpu.memory_space<vmem>>, vector<1x128xf32>
    %122 = arith.mulf %119, %121 : vector<1x128xf32>
    %123 = vector.shape_cast %122 : vector<1x128xf32> to vector<1x1x128xf32>
    %cst_46 = arith.constant dense<0.000000e+00> : vector<1xf32>
    %124 = vector.multi_reduction <add>, %123, %cst_46 [1, 2] : vector<1x1x128xf32> to vector<1xf32>
    %125 = vector.shape_cast %124 : vector<1xf32> to vector<1x1x1xf32>
    %126 = vector.extract %125[0, 0, 0] : f32 from vector<1x1x1xf32>
    %cst_47 = arith.constant 0.000000e+00 : f32
    %127 = arith.subf %cst_47, %126 : f32
    %cst_48 = arith.constant 0.000000e+00 : f32
    %128 = arith.maximumf %127, %cst_48 : f32
    %129 = arith.addf %113, %128 : f32
    %130 = math.absf %126 : f32
    %cst_49 = arith.constant 0.000000e+00 : f32
    %131 = arith.subf %cst_49, %130 : f32
    %132 = math.exp %131 : f32
    %133 = math.log1p %132 : f32
    %134 = arith.addf %129, %133 : f32
    %c5_i32 = arith.constant 5 : i32
    %135 = arith.index_cast %c5_i32 : i32 to index
    %136 = memref.load %arg1[%135] : memref<8xi32, #tpu.memory_space<smem>>
    %137 = arith.index_cast %c5_i32 : i32 to index
    %138 = memref.load %arg2[%137] : memref<8xi32, #tpu.memory_space<smem>>
    %139 = arith.index_cast %136 : i32 to index
    %c0_50 = arith.constant 0 : index
    %140 = vector.load %arg4[%139, %c0_50] : memref<24x128xf32, #tpu.memory_space<vmem>>, vector<1x128xf32>
    %141 = arith.index_cast %138 : i32 to index
    %c0_51 = arith.constant 0 : index
    %142 = vector.load %arg4[%141, %c0_51] : memref<24x128xf32, #tpu.memory_space<vmem>>, vector<1x128xf32>
    %143 = arith.mulf %140, %142 : vector<1x128xf32>
    %144 = vector.shape_cast %143 : vector<1x128xf32> to vector<1x1x128xf32>
    %cst_52 = arith.constant dense<0.000000e+00> : vector<1xf32>
    %145 = vector.multi_reduction <add>, %144, %cst_52 [1, 2] : vector<1x1x128xf32> to vector<1xf32>
    %146 = vector.shape_cast %145 : vector<1xf32> to vector<1x1x1xf32>
    %147 = vector.extract %146[0, 0, 0] : f32 from vector<1x1x1xf32>
    %cst_53 = arith.constant 0.000000e+00 : f32
    %148 = arith.subf %cst_53, %147 : f32
    %cst_54 = arith.constant 0.000000e+00 : f32
    %149 = arith.maximumf %148, %cst_54 : f32
    %150 = arith.addf %134, %149 : f32
    %151 = math.absf %147 : f32
    %cst_55 = arith.constant 0.000000e+00 : f32
    %152 = arith.subf %cst_55, %151 : f32
    %153 = math.exp %152 : f32
    %154 = math.log1p %153 : f32
    %155 = arith.addf %150, %154 : f32
    %c6_i32 = arith.constant 6 : i32
    %156 = arith.index_cast %c6_i32 : i32 to index
    %157 = memref.load %arg1[%156] : memref<8xi32, #tpu.memory_space<smem>>
    %158 = arith.index_cast %c6_i32 : i32 to index
    %159 = memref.load %arg2[%158] : memref<8xi32, #tpu.memory_space<smem>>
    %160 = arith.index_cast %157 : i32 to index
    %c0_56 = arith.constant 0 : index
    %161 = vector.load %arg4[%160, %c0_56] : memref<24x128xf32, #tpu.memory_space<vmem>>, vector<1x128xf32>
    %162 = arith.index_cast %159 : i32 to index
    %c0_57 = arith.constant 0 : index
    %163 = vector.load %arg4[%162, %c0_57] : memref<24x128xf32, #tpu.memory_space<vmem>>, vector<1x128xf32>
    %164 = arith.mulf %161, %163 : vector<1x128xf32>
    %165 = vector.shape_cast %164 : vector<1x128xf32> to vector<1x1x128xf32>
    %cst_58 = arith.constant dense<0.000000e+00> : vector<1xf32>
    %166 = vector.multi_reduction <add>, %165, %cst_58 [1, 2] : vector<1x1x128xf32> to vector<1xf32>
    %167 = vector.shape_cast %166 : vector<1xf32> to vector<1x1x1xf32>
    %168 = vector.extract %167[0, 0, 0] : f32 from vector<1x1x1xf32>
    %cst_59 = arith.constant 0.000000e+00 : f32
    %169 = arith.subf %cst_59, %168 : f32
    %cst_60 = arith.constant 0.000000e+00 : f32
    %170 = arith.maximumf %169, %cst_60 : f32
    %171 = arith.addf %155, %170 : f32
    %172 = math.absf %168 : f32
    %cst_61 = arith.constant 0.000000e+00 : f32
    %173 = arith.subf %cst_61, %172 : f32
    %174 = math.exp %173 : f32
    %175 = math.log1p %174 : f32
    %176 = arith.addf %171, %175 : f32
    %c7_i32 = arith.constant 7 : i32
    %177 = arith.index_cast %c7_i32 : i32 to index
    %178 = memref.load %arg1[%177] : memref<8xi32, #tpu.memory_space<smem>>
    %179 = arith.index_cast %c7_i32 : i32 to index
    %180 = memref.load %arg2[%179] : memref<8xi32, #tpu.memory_space<smem>>
    %181 = arith.index_cast %178 : i32 to index
    %c0_62 = arith.constant 0 : index
    %182 = vector.load %arg4[%181, %c0_62] : memref<24x128xf32, #tpu.memory_space<vmem>>, vector<1x128xf32>
    %183 = arith.index_cast %180 : i32 to index
    %c0_63 = arith.constant 0 : index
    %184 = vector.load %arg4[%183, %c0_63] : memref<24x128xf32, #tpu.memory_space<vmem>>, vector<1x128xf32>
    %185 = arith.mulf %182, %184 : vector<1x128xf32>
    %186 = vector.shape_cast %185 : vector<1x128xf32> to vector<1x1x128xf32>
    %cst_64 = arith.constant dense<0.000000e+00> : vector<1xf32>
    %187 = vector.multi_reduction <add>, %186, %cst_64 [1, 2] : vector<1x1x128xf32> to vector<1xf32>
    %188 = vector.shape_cast %187 : vector<1xf32> to vector<1x1x1xf32>
    %189 = vector.extract %188[0, 0, 0] : f32 from vector<1x1x1xf32>
    %cst_65 = arith.constant 0.000000e+00 : f32
    %190 = arith.subf %cst_65, %189 : f32
    %cst_66 = arith.constant 0.000000e+00 : f32
    %191 = arith.maximumf %190, %cst_66 : f32
    %192 = arith.addf %176, %191 : f32
    %193 = math.absf %189 : f32
    %cst_67 = arith.constant 0.000000e+00 : f32
    %194 = arith.subf %cst_67, %193 : f32
    %195 = math.exp %194 : f32
    %196 = math.log1p %195 : f32
    %197 = arith.addf %192, %196 : f32
    %c8_i32 = arith.constant 8 : i32
    %198 = tpu.iota {dimensions = array<i32: 0>} : vector<16x16xi32>
    %199 = tpu.iota {dimensions = array<i32: 1>} : vector<16x16xi32>
    %200 = arith.cmpi eq, %198, %199 : vector<16x16xi32>
    %cst_68 = arith.constant 0.000000e+00 : f32
    %201 = vector.broadcast %cst_68 : f32 to vector<16x16xf32>
    %202 = arith.select %200, %201, %6 : vector<16x16xi1>, vector<16x16xf32>
    %cst_69 = arith.constant dense<0.000000e+00> : vector<16x16xf32>
    %203 = tpu.matmul %202, %26, %cst_69 {dimension_numbers = #tpu.dot_dimension_numbers<[1], [0], [0], [1], [0, 0, 1, 1], [], []>} : vector<16x16xf32>, vector<16x16xf32>, vector<16x16xf32> -> vector<16x16xf32>
    %204 = math.absf %202 : vector<16x16xf32>
    %205 = vector.shape_cast %204 : vector<16x16xf32> to vector<1x16x16xf32>
    %cst_70 = arith.constant dense<0.000000e+00> : vector<1xf32>
    %206 = vector.multi_reduction <add>, %205, %cst_70 [1, 2] : vector<1x16x16xf32> to vector<1xf32>
    %207 = vector.shape_cast %206 : vector<1xf32> to vector<1x1x1xf32>
    %208 = vector.extract %207[0, 0, 0] : f32 from vector<1x1x1xf32>
    %cst_71 = arith.constant dense<0.000000e+00> : vector<16x32xf32>
    %209 = tpu.matmul %203, %4, %cst_71 {dimension_numbers = #tpu.dot_dimension_numbers<[1], [0], [0], [1], [0, 0, 1, 1], [], []>} : vector<16x16xf32>, vector<16x32xf32>, vector<16x32xf32> -> vector<16x32xf32>
    %cst_72 = arith.constant dense<0.000000e+00> : vector<16x32xf32>
    %210 = tpu.matmul %1, %209, %cst_72 {dimension_numbers = #tpu.dot_dimension_numbers<[1], [0], [0], [1], [0, 0, 1, 1], [], []>} : vector<16x16xf32>, vector<16x32xf32>, vector<16x32xf32> -> vector<16x32xf32>
    %cst_73 = arith.constant 0.000000e+00 : f32
    %211 = vector.broadcast %cst_73 : f32 to vector<16x32xf32>
    %212 = arith.cmpf ogt, %210, %211 : vector<16x32xf32>
    %cst_74 = arith.constant 0.000000e+00 : f32
    %213 = vector.broadcast %cst_74 : f32 to vector<16x32xf32>
    %214 = arith.minimumf %210, %213 : vector<16x32xf32>
    %215 = math.exp %214 : vector<16x32xf32>
    %cst_75 = arith.constant 1.000000e+00 : f32
    %216 = vector.broadcast %cst_75 : f32 to vector<16x32xf32>
    %217 = arith.subf %215, %216 : vector<16x32xf32>
    %218 = arith.select %212, %210, %217 : vector<16x32xi1>, vector<16x32xf32>
    %cst_76 = arith.constant dense<0.000000e+00> : vector<16x32xf32>
    %219 = tpu.matmul %218, %5, %cst_76 {dimension_numbers = #tpu.dot_dimension_numbers<[1], [0], [0], [1], [0, 0, 1, 1], [], []>} : vector<16x32xf32>, vector<32x32xf32>, vector<16x32xf32> -> vector<16x32xf32>
    %cst_77 = arith.constant dense<0.000000e+00> : vector<16x32xf32>
    %220 = tpu.matmul %1, %219, %cst_77 {dimension_numbers = #tpu.dot_dimension_numbers<[1], [0], [0], [1], [0, 0, 1, 1], [], []>} : vector<16x16xf32>, vector<16x32xf32>, vector<16x32xf32> -> vector<16x32xf32>
    %cst_78 = arith.constant 0.000000e+00 : f32
    %221 = vector.broadcast %cst_78 : f32 to vector<16x32xf32>
    %222 = arith.cmpf ogt, %220, %221 : vector<16x32xf32>
    %cst_79 = arith.constant 0.000000e+00 : f32
    %223 = vector.broadcast %cst_79 : f32 to vector<16x32xf32>
    %224 = arith.minimumf %220, %223 : vector<16x32xf32>
    %225 = math.exp %224 : vector<16x32xf32>
    %cst_80 = arith.constant 1.000000e+00 : f32
    %226 = vector.broadcast %cst_80 : f32 to vector<16x32xf32>
    %227 = arith.subf %225, %226 : vector<16x32xf32>
    %228 = arith.select %222, %220, %227 : vector<16x32xi1>, vector<16x32xf32>
    %229 = arith.subf %0, %228 : vector<16x32xf32>
    %230 = arith.mulf %229, %229 : vector<16x32xf32>
    %231 = vector.shape_cast %230 : vector<16x32xf32> to vector<1x16x32xf32>
    %cst_81 = arith.constant dense<0.000000e+00> : vector<1xf32>
    %232 = vector.multi_reduction <add>, %231, %cst_81 [1, 2] : vector<1x16x32xf32> to vector<1xf32>
    %233 = vector.shape_cast %232 : vector<1xf32> to vector<1x1x1xf32>
    %234 = vector.extract %233[0, 0, 0] : f32 from vector<1x1x1xf32>
    %cst_82 = arith.constant 5.120000e+02 : f32
    %235 = arith.divf %234, %cst_82 : f32
    %236 = arith.subf %26, %203 : vector<16x16xf32>
    %237 = arith.mulf %236, %236 : vector<16x16xf32>
    %238 = vector.shape_cast %237 : vector<16x16xf32> to vector<1x16x16xf32>
    %cst_83 = arith.constant dense<0.000000e+00> : vector<1xf32>
    %239 = vector.multi_reduction <add>, %238, %cst_83 [1, 2] : vector<1x16x16xf32> to vector<1xf32>
    %240 = vector.shape_cast %239 : vector<1xf32> to vector<1x1x1xf32>
    %241 = vector.extract %240[0, 0, 0] : f32 from vector<1x1x1xf32>
    %cst_84 = arith.constant 2.560000e+02 : f32
    %242 = arith.divf %241, %cst_84 : f32
    %cst_85 = arith.constant 5.000000e-01 : f32
    %243 = arith.mulf %cst_85, %242 : f32
    %cst_86 = arith.constant 1.000000e-01 : f32
    %244 = arith.mulf %cst_86, %197 : f32
    %245 = arith.addf %235, %244 : f32
    %246 = arith.addf %245, %243 : f32
    %247 = arith.addf %246, %208 : f32
    %248 = tpu.iota {dimensions = array<i32: 0>} : vector<8x128xi32>
    %249 = tpu.iota {dimensions = array<i32: 1>} : vector<8x128xi32>
    %c0_i32_87 = arith.constant 0 : i32
    %250 = vector.broadcast %c0_i32_87 : i32 to vector<8x128xi32>
    %251 = arith.cmpi eq, %248, %250 : vector<8x128xi32>
    %c0_i32_88 = arith.constant 0 : i32
    %252 = vector.broadcast %c0_i32_88 : i32 to vector<8x128xi32>
    %253 = arith.cmpi eq, %249, %252 : vector<8x128xi32>
    %254 = arith.andi %251, %253 : vector<8x128xi1>
    %cst_89 = arith.constant 0.000000e+00 : f32
    %255 = vector.broadcast %235 : f32 to vector<8x128xf32>
    %256 = vector.broadcast %cst_89 : f32 to vector<8x128xf32>
    %257 = arith.select %254, %255, %256 : vector<8x128xi1>, vector<8x128xf32>
    %c0_i32_90 = arith.constant 0 : i32
    %258 = vector.broadcast %c0_i32_90 : i32 to vector<8x128xi32>
    %259 = arith.cmpi eq, %248, %258 : vector<8x128xi32>
    %c1_i32_91 = arith.constant 1 : i32
    %260 = vector.broadcast %c1_i32_91 : i32 to vector<8x128xi32>
    %261 = arith.cmpi eq, %249, %260 : vector<8x128xi32>
    %262 = arith.andi %259, %261 : vector<8x128xi1>
    %263 = vector.broadcast %197 : f32 to vector<8x128xf32>
    %264 = arith.select %262, %263, %257 : vector<8x128xi1>, vector<8x128xf32>
    %c0_i32_92 = arith.constant 0 : i32
    %265 = vector.broadcast %c0_i32_92 : i32 to vector<8x128xi32>
    %266 = arith.cmpi eq, %248, %265 : vector<8x128xi32>
    %c2_i32_93 = arith.constant 2 : i32
    %267 = vector.broadcast %c2_i32_93 : i32 to vector<8x128xi32>
    %268 = arith.cmpi eq, %249, %267 : vector<8x128xi32>
    %269 = arith.andi %266, %268 : vector<8x128xi1>
    %270 = vector.broadcast %243 : f32 to vector<8x128xf32>
    %271 = arith.select %269, %270, %264 : vector<8x128xi1>, vector<8x128xf32>
    %c0_i32_94 = arith.constant 0 : i32
    %272 = vector.broadcast %c0_i32_94 : i32 to vector<8x128xi32>
    %273 = arith.cmpi eq, %248, %272 : vector<8x128xi32>
    %c3_i32_95 = arith.constant 3 : i32
    %274 = vector.broadcast %c3_i32_95 : i32 to vector<8x128xi32>
    %275 = arith.cmpi eq, %249, %274 : vector<8x128xi32>
    %276 = arith.andi %273, %275 : vector<8x128xi1>
    %277 = vector.broadcast %208 : f32 to vector<8x128xf32>
    %278 = arith.select %276, %277, %271 : vector<8x128xi1>, vector<8x128xf32>
    %c0_i32_96 = arith.constant 0 : i32
    %279 = vector.broadcast %c0_i32_96 : i32 to vector<8x128xi32>
    %280 = arith.cmpi eq, %248, %279 : vector<8x128xi32>
    %c4_i32_97 = arith.constant 4 : i32
    %281 = vector.broadcast %c4_i32_97 : i32 to vector<8x128xi32>
    %282 = arith.cmpi eq, %249, %281 : vector<8x128xi32>
    %283 = arith.andi %280, %282 : vector<8x128xi1>
    %284 = vector.broadcast %247 : f32 to vector<8x128xf32>
    %285 = arith.select %283, %284, %278 : vector<8x128xi1>, vector<8x128xf32>
    %c16_98 = arith.constant 16 : index
    %c0_99 = arith.constant 0 : index
    %286 = vector.load %arg4[%c16_98, %c0_99] : memref<24x128xf32, #tpu.memory_space<vmem>>, vector<8x128xf32>
    tpu.vector_store %arg4[%c16_98, %c0_99], %285 {strides = array<i32>} : memref<24x128xf32, #tpu.memory_space<vmem>>, vector<8x128xf32>,
    return
  }
  func.func @transform_0(%arg0: i32, %arg1: memref<8xi32, #tpu.memory_space<smem>>, %arg2: memref<8xi32, #tpu.memory_space<smem>>) -> (i32, i32) {
    %c0_i32 = arith.constant 0 : i32
    %c0_i32_0 = arith.constant 0 : i32
    %c0_i32_1 = arith.constant 0 : i32
    return %c0_i32, %c0_i32_0 : i32, i32
  }
  func.func @transform_1(%arg0: i32, %arg1: memref<8xi32, #tpu.memory_space<smem>>, %arg2: memref<8xi32, #tpu.memory_space<smem>>) -> (i32, i32) {
    %c0_i32 = arith.constant 0 : i32
    %c0_i32_0 = arith.constant 0 : i32
    %c0_i32_1 = arith.constant 0 : i32
    return %c0_i32, %c0_i32_0 : i32, i32
  }
}

</mosaic_0001>

<bundles_post_ra>
// kernel: tpu_custom_call.1
= control target key start
LH: loop header
LB: loop body
LE: loop exit
PB: predicated region body
PF: predicated region fallthrough
CT: control target
= control target key end

     0   :  { %s1576_s12 = smov [#allocation3]   ;;  %s1864_s0 = inlined_call_operand.hbm [shape: s32[8], index: 0, kind: input, shape index: {}]   ;;  %s1865_s2 = inlined_call_operand.hbm [shape: f32[160,128], index: 2, kind: input, shape index: {}]   ;;  %s1866_s3 = inlined_call_operand.hbm [shape: f32[24,128], index: 3, kind: output, shape index: {}]   ;;  %s1867_s1 = inlined_call_operand.vmem [shape: s32[8], index: 1, kind: input, shape index: {}]  }
   0x1   :  { %9 = dma.hbm_to_smem %s1864_s0, 16, %s1576_s12, [#allocation2] }
   0x2   :  { %s10_s17 = sshll.u32 %s1867_s1, 4  ;;  %s11_s17 = int_to_ptr.vmem [resolvable:$true] %s10_s17 }
   0x3   :  { %s1518_s18 = scalar_lea.vmem %s11_s17, 16  ;;  %p1523_p1 = scmp.lt.s32.totalorder %s11_s17, %s11_s17 }
   0x4   :  { %p1519_p0 = scmp.ne.s32.totalorder %s11_s17, %s1518_s18  ;;  %p1524_p2 = scmp.lt.s32.totalorder %s1518_s18, %s1518_s18 }
   0x6   :  { %p1525_p3 = por %p1524_p2, %p1523_p1 }
   0x8   :  { %p1526_p4 = pnand %p1525_p3, %p1519_p0 }
   0xa   :  { %1529 = shalt.err (!%p1526_p4)  }
   0xb   :  { %s1577_s19 = smov [#allocation4]  }
   0xc   :  { %13 = dma.vmem_to_smem %s11_s17, 16, %s1577_s19, [#allocation2] }
   0xd   :  { %1570 = dma.done.wait [#allocation2], 32 }
   0xe   :  { %1571 = vsyncadd [#allocation2], 4294967264 }
   0xf   :  { %15 = sfence }
  0x10   :  { %16 = vsyncpa [#allocation6], 0 }
  0x11   :  { %17 = vsyncpa [#allocation7], 0  ;;  %s1578_s0 = smov [#allocation5]  }
  0x12   :  { %s23_s20 = sshll.u32 %s1578_s0, 4  ;;  %s24_s20 = int_to_ptr.vmem [resolvable:$true] %s23_s20 }
  0x13   :  { %s1538_s21 = scalar_lea.vmem %s24_s20, 2560  ;;  %p1543_p6 = scmp.lt.s32.totalorder %s24_s20, %s24_s20 }
  0x14   :  { %p1539_p5 = scmp.ne.s32.totalorder %s24_s20, %s1538_s21  ;;  %p1544_p7 = scmp.lt.s32.totalorder %s1538_s21, %s1538_s21 }
  0x16   :  { %p1545_p8 = por %p1544_p7, %p1543_p6 }
  0x18   :  { %p1546_p9 = pnand %p1545_p8, %p1539_p5 }
  0x1a   :  { %1549 = shalt.err (!%p1546_p9)
}
  0x1b   :  { %s1579_s1 = smov 128   ;;  %s1580_s22 = smov 8  }
  0x1c   :  { %29 = dma.hbm_to_vmem [thread:$0]  %s1865_s2, 2560, %s24_s20, [#allocation6], %s1579_s1, %s1579_s1, %s1580_s22  }
  0x1d   :  { %1572 = dma.done.wait [#allocation6], 2560  }
  0x1e   :  { %1573 = vsyncadd [#allocation6], 4294964736  ;;  %vm53_vm0 = vcmask 261120   ;;  %v40_v0 = vld [vmem:[#allocation5 + $0x38] sm:$0xff]  ;;  %v39_v1 = vld [vmem:[#allocation5 + $0x30] sm:$0xff]  ;;  %vm135_vm1 = vcmask 130048   ;;  %v706_v28 = vlaneseq }
  0x1f   :  { %1326 = vmatprep.subr.mxu0 %v40_v0  ;;  %v1615_v2 = vld [vmem:[#allocation5] sm:$0xff]  ;;  %v38_v3 = vld [vmem:[#allocation5 + $0x28] sm:$0xff]  ;;  %v1623_v6 = vld [vmem:[#allocation5 + $0x10] sm:$0xff]  ;;  %s1647_s2 = sld [smem:[#allocation3 + $0x2]]  ;;  %vm408_vm8 = vcmask 1040384  }
  0x20   :  { %1327 = vmatpush3.msra.mxu0 %v40_v0  ;;  %1334 = vmatprep.mubr.msk.f32.mxu0 %vm53_vm0, %v1615_v2  ;;  %v37_v4 = vld [vmem:[#allocation5 + $0x20] sm:$0xff]  ;;  %v1619_v5 = vld [vmem:[#allocation5 + $0x8] sm:$0xff]  ;;  %v1629_v9 = vld [vmem:[#allocation5 + $0x18] sm:$0xff]  ;;  %v1637_v29 = vshrl.u32 %v706_v28, 7  ;;  %v1639_v30 = vand.u32 127, %v706_v28  ;;  %s1649_s25 = sld [smem:[#allocation4 + $0x2]] }
  0x21   :  { %1328 = vmatprep.subr.mxu0 %v39_v1  ;;  %1341 = vmatprep.mubr.msk.f32.mxu1 %vm135_vm1, %v1623_v6  ;;  %v44_v10 = vld [vmem:[#allocation5 + $0x58] sm:$0xff]  ;;  %v43_v11 = vld [vmem:[#allocation5 + $0x50] sm:$0xff]  ;;  %v42_v12 = vld [vmem:[#allocation5 + $0x48] sm:$0xff]  ;;  %s1652_s26 = sld [smem:[#allocation3]] }
  0x22   :  { %1329 = vmatpush3.msra.mxu0 %v39_v1  ;;  %v41_v13 = vld [vmem:[#allocation5 + $0x40] sm:$0xff]  ;;  %v51_v31 = vld [vmem:[#allocation5 + $0x90] sm:$0xff]  ;;  %vm711_vm4 = vcmp.eq.s32.totalorder %v1637_v29, %v1639_v30  ;;  %v708_v39 = vadd.s32 8, %v1637_v29  ;;  %s1654_s27 = sld [smem:[#allocation4]]  ;;  %v52_v43 = vld [vmem:[#allocation5 + $0x98] sm:$0xff] }
  0x23   :  { %1330 = vmatprep.subr.mxu0 %v38_v3  ;;  %v1643_v32 = vsel %vm711_vm4, 0.0, %v51_v31  ;;  %s1656_s28 = sld [smem:[#allocation3 + $0x3]]  ;;  %v45_v28 = vld [vmem:[#allocation5 + $0x60] sm:$0xff] }
  0x24   :  { %1331 = vmatpush3.msra.mxu0 %v38_v3  ;;  %s1658_s29 = sld [smem:[#allocation4 + $0x3]]  ;;  %vm712_vm6 = vcmp.eq.s32.totalorder %v708_v39, %v1639_v30 }
  0x25   :  { %1332 = vmatprep.subr.mxu0 %v37_v4  ;;  %s1661_s30 = sld [smem:[#allocation3 + $0x1]]  ;;  %v1675_v48 = vsel %vm712_vm6, 0.0, %v52_v43  ;;  %s480_s13 = scalar_lea.vmem [#allocation8], %s1647_s2  ;;  %vm1190_vm6 = vcmp.eq.s32.totalorder %v1639_v30, 0 }
  0x26   :  { %1333 = vmatpush3.msra.mxu0 %v37_v4  ;;  %s1665_s4 = sld [smem:[#allocation4 + $0x1]]  ;;  %s482_s14 = scalar_lea.vmem [#allocation8], %s1649_s25 }
  0x27   :  { %1335 = vmatmul.mubr.msk.f32.vlgmr.msra.gmra.mxu0 %vm53_vm0, %v1619_v5  ;;  %s1670_s5 = sld [smem:[#allocation3 + $0x5]]  ;;  %s403_s15 = scalar_lea.vmem [#allocation8], %s1652_s26 }
  0x28   :  { %1359 = vmatprep.mubr.msk.f32.mxu0 %vm135_vm1, %v1623_v6  ;;  %s1677_s6 = sld [smem:[#allocation4 + $0x5]]  ;;  %s405_s16 = scalar_lea.vmem [#allocation8], %s1654_s27 }
  0x29   :  { %s1683_s7 = sld [smem:[#allocation3 + $0x4]]  ;;  %s518_s17 = scalar_lea.vmem [#allocation8], %s1656_s28 }
  0x2a   :  { %s1687_s8 = sld [smem:[#allocation4 + $0x4]]  ;;  %s520_s18 = scalar_lea.vmem [#allocation8], %s1658_s29 }
  0x2b   :  { %s1689_s9 = sld [smem:[#allocation3 + $0x7]]  ;;  %s442_s19 = scalar_lea.vmem [#allocation8], %s1661_s30 }
  0x2c   :  { %s1693_s10 = sld [smem:[#allocation4 + $0x7]]  ;;  %s444_s0 = scalar_lea.vmem [#allocation8], %s1665_s4 }
  0x2d   :  { %s1695_s11 = sld [smem:[#allocation3 + $0x6]]  ;;  %s594_s20 = scalar_lea.vmem [#allocation8], %s1670_s5 }
  0x2e   :  { %s1697_s12 = sld [smem:[#allocation4 + $0x6]]  ;;  %s596_s21 = scalar_lea.vmem [#allocation8], %s1677_s6 }
  0x2f   :  { %s556_s23 = scalar_lea.vmem [#allocation8], %s1683_s7 }
  0x30   :  { %s558_s24 = scalar_lea.vmem [#allocation8], %s1687_s8 }
  0x31   :  { %s670_s2 = scalar_lea.vmem [#allocation8], %s1689_s9 }
  0x32   :  { %s672_s25 = scalar_lea.vmem [#allocation8], %s1693_s10 }
  0x33   :  { %s632_s26 = scalar_lea.vmem [#allocation8], %s1695_s11 }
  0x34   :  { %s634_s27 = scalar_lea.vmem [#allocation8], %s1697_s12  ;;  %s1581_s12 = smov 0.0  }
  0xe7   :  { %v1336_v7 = vpop.f32.mrf.mxu0 }
  0xe8   :  { %1337 = vmatprep.subr.mxu1 %v1336_v7 }
  0xe9   :  { %v126_v8 = vpop.f32.mrf.mxu0  ;;  %1338 = vmatpush3.msra.mxu1 %v1336_v7 }
  0xea   :  { %1339 = vmatprep.subr.mxu1 %v126_v8 }
  0xeb   :  { %1340 = vmatpush3.msra.mxu1 %v126_v8 }
  0xec   :  { %1342 = vmatmul.mubr.msk.f32.vlgmr.msra.gmra.mxu1 %vm135_vm1, %v1629_v9  ;;  %1344 = vmatprep.subr.mxu1 %v44_v10 }
  0xed   :  { %1345 = vmatpush3.msra.mxu1 %v44_v10 }
  0xee   :  { %1346 = vmatprep.subr.mxu1 %v43_v11 }
  0xef   :  { %1347 = vmatpush3.msra.mxu1 %v43_v11 }
  0xf0   :  { %1348 = vmatprep.subr.mxu1 %v42_v12 }
  0xf1   :  { %1349 = vmatpush3.msra.mxu1 %v42_v12 }
  0xf2   :  { %1350 = vmatprep.subr.mxu1 %v41_v13 }
  0xf3   :  { %1351 = vmatpush3.msra.mxu1 %v41_v13 }
 0x1ac   :  { %v1343_v14 = vpop.f32.mrf.mxu1 }
 0x1ad   :  { %v220_v15 = vmin.f32 %v1343_v14, 0.0  ;;  %vm218_vm3 = vcmp.gt.f32.partialorder %v1343_v14, 0.0 }
 0x1ae   :  { %v208_v16 = vpop.f32.mrf.mxu1 }
 0x1af   :  { %v223_v17 = vmul.f32 1.442695, %v220_v15  ;;  %v219_v18 = vmin.f32 %v208_v16, 0.0  ;;  %vm217_vm2 = vcmp.gt.f32.partialorder %v208_v16, 0.0 }
 0x1b1   :  { %1462 = vpow2.f32 %v223_v17  ;;  %v221_v19 = vmul.f32 1.442695, %v219_v18 }
 0x1b3   :  { %1464 = vpow2.f32 %v221_v19 }
 0x1be   :  { %v1463_v20 = vpop.eup %1462 }
 0x1bf   :  { %v1249_v22 = vadd.f32 -1.0, %v1463_v20 }
 0x1c0   :  { %v1465_v21 = vpop.eup %1464 }
 0x1c1   :  { %v1248_v23 = vadd.f32 -1.0, %v1465_v21  ;;  %v228_v25 = vsel %vm218_vm3, %v1343_v14, %v1249_v22  ;;  %v796_v22 = vand.u32 2147483647, %v1643_v32 }
 0x1c3   :  { %v227_v24 = vsel %vm217_vm2, %v208_v16, %v1248_v23  ;;  %v797_v23 = vand.u32 2147483647, %v1675_v48 }
 0x1c4   :  { %1352 = vmatprep.mubr.msk.f32.mxu1 %vm53_vm0, %v227_v24  ;;  %v798_v24 = vsel %vm135_vm1, %v796_v22, 0.0 }
 0x1c5   :  { %1353 = vmatmul.mubr.msk.f32.vlgmr.msra.gmra.mxu1 %vm53_vm0, %v228_v25  ;;  %v799_v25 = vsel %vm135_vm1, %v797_v23, 0.0 }
 0x285   :  { %v1354_v26 = vpop.f32.mrf.mxu1 }
 0x286   :  { %1355 = vmatprep.subr.mxu0 %v1354_v26 }
 0x287   :  { %v301_v27 = vpop.f32.mrf.mxu1  ;;  %1356 = vmatpush3.msra.mxu0 %v1354_v26  ;;  %v800_v26 = vadd.f32 %v799_v25, %v798_v24 }
 0x288   :  { %1357 = vmatprep.subr.mxu0 %v301_v27 }
 0x289   :  { %1358 = vmatpush3.msra.mxu0 %v301_v27  ;;  %v46_v27 = vld [vmem:[#allocation5 + $0x68] sm:$0xff] }
 0x28a   :  { %1360 = vmatmul.mubr.msk.f32.vlgmr.msra.gmra.mxu0 %vm135_vm1, %v1629_v9  ;;  %1369 = vmatprep.subr.mxu1 %v46_v27 }
 0x28b   :  { %1366 = vmatprep.mubr.msk.f32.mxu0 %vm135_vm1, %v1643_v32  ;;  %1370 = vmatpush3.msra.mxu1 %v46_v27 }
 0x28c   :  { %1371 = vmatprep.subr.mxu1 %v45_v28 }
 0x28d   :  { %1372 = vmatpush3.msra.mxu1 %v45_v28 }
 0x34a   :  { %v1361_v33 = vpop.f32.mrf.mxu0 }
 0x34b   :  { %v388_v34 = vmin.f32 %v1361_v33, 0.0  ;;  %vm386_vm5 = vcmp.gt.f32.partialorder %v1361_v33, 0.0 }
 0x34c   :  { %v376_v35 = vpop.f32.mrf.mxu0 }
 0x34d   :  { %v391_v36 = vmul.f32 1.442695, %v388_v34  ;;  %v387_v37 = vmin.f32 %v376_v35, 0.0  ;;  %vm385_vm7 = vcmp.gt.f32.partialorder %v376_v35, 0.0 }
 0x34f   :  { %1466 = vpow2.f32 %v391_v36  ;;  %v389_v38 = vmul.f32 1.442695, %v387_v37 }
 0x351   :  { %1468 = vpow2.f32 %v389_v38 }
 0x35c   :  { %v1467_v40 = vpop.eup %1466 }
 0x35d   :  { %v1255_v41 = vadd.f32 -1.0, %v1467_v40 }
 0x35e   :  { %v1469_v42 = vpop.eup %1468 }
 0x35f   :  { %v1663_v44 = vsel %vm386_vm5, %v1361_v33, %v1255_v41  ;;  %v1254_v45 = vadd.f32 -1.0, %v1469_v42  ;;  %vm1189_vm5 = vcmp.eq.s32.totalorder %v1637_v29, 0 }
 0x360   :  { %v398_v46 = vsel %vm135_vm1, %v1663_v44, 0.0  ;;  %1362 = vmatprep.subr.mxu0 %v1663_v44 }
 0x361   :  { %400 = vst [vmem:[#allocation8 + $0x8] sm:$0xff] %v398_v46  ;;  %1363 = vmatpush3.msra.mxu0 %v1663_v44  ;;  %v1673_v47 = vsel %vm385_vm7, %v376_v35, %v1254_v45  ;;  %vm1194_vm7 = vcmp.eq.s32.totalorder %v1639_v30, 1 }
 0x362   :  { %v397_v49 = vsel %vm135_vm1, %v1673_v47, 0.0  ;;  %1364 = vmatprep.subr.mxu0 %v1673_v47 }
 0x363   :  { %399 = vst [vmem:[#allocation8] sm:$0xff] %v397_v49  ;;  %1365 = vmatpush3.msra.mxu0 %v1673_v47 }
 0x364   :  { %1367 = vmatmul.mubr.msk.f32.vlgmr.msra.gmra.mxu0 %vm135_vm1, %v1675_v48 }
 0x365   :  { %1380 = vmatprep.mubr.msk.f32.mxu0 %vm135_vm1, %v1623_v6 }
 0x36a   :  { %v481_v50 = vld [vmem:[%s480_s13] sm:$0x1] }
 0x36b   :  { %v483_v51 = vld [vmem:[%s482_s14] sm:$0x1] }
 0x36c   :  { %v404_v52 = vld [vmem:[%s403_s15] sm:$0x1]  ;;  %v484_v53 = vmul.f32 %v483_v51, %v481_v50 }
 0x36d   :  { %v406_v54 = vld [vmem:[%s405_s16] sm:$0x1] }
 0x36e   :  { %v519_v55 = vld [vmem:[%s518_s17] sm:$0x1]  ;;  %v407_v57 = vmul.f32 %v406_v54, %v404_v52  ;;  %v485_v60 = vsel %vm408_vm8, %v484_v53, 0.0 }
 0x36f   :  { %v521_v56 = vld [vmem:[%s520_s18] sm:$0x1]  ;;  %486 = vadd.xlane.f32.xlu1 %v485_v60 }
 0x370   :  { %v443_v58 = vld [vmem:[%s442_s19] sm:$0x1]  ;;  %v522_v61 = vmul.f32 %v521_v56, %v519_v55  ;;  %v409_v62 = vsel %vm408_vm8, %v407_v57, 0.0 }
 0x371   :  { %v445_v59 = vld [vmem:[%s444_s0] sm:$0x1]  ;;  %410 = vadd.xlane.f32.xlu0 %v409_v62 }
 0x372   :  { %v446_v63 = vmul.f32 %v445_v59, %v443_v58  ;;  %v595_v0 = vld [vmem:[%s594_s20] sm:$0x1]  ;;  %v523_v7 = vsel %vm408_vm8, %v522_v61, 0.0 }
 0x373   :  { %v597_v1 = vld [vmem:[%s596_s21] sm:$0x1]  ;;  %524 = vadd.xlane.f32.xlu1 %v523_v7 }
 0x374   :  { %v557_v3 = vld [vmem:[%s556_s23] sm:$0x1]  ;;  %v598_v8 = vmul.f32 %v597_v1, %v595_v0  ;;  %v447_v10 = vsel %vm408_vm8, %v446_v63, 0.0 }
 0x375   :  { %v559_v4 = vld [vmem:[%s558_s24] sm:$0x1]  ;;  %448 = vadd.xlane.f32.xlu0 %v447_v10 }
 0x376   :  { %v560_v11 = vmul.f32 %v559_v4, %v557_v3  ;;  %v671_v12 = vld [vmem:[%s670_s2] sm:$0x1]  ;;  %v599_v16 = vsel %vm408_vm8, %v598_v8, 0.0 }
 0x377   :  { %v673_v13 = vld [vmem:[%s672_s25] sm:$0x1]  ;;  %600 = vadd.xlane.f32.xlu1 %v599_v16 }
 0x378   :  { %v633_v14 = vld [vmem:[%s632_s26] sm:$0x1]  ;;  %v674_v17 = vmul.f32 %v673_v13, %v671_v12  ;;  %v561_v18 = vsel %vm408_vm8, %v560_v11, 0.0 }
 0x379   :  { %v635_v15 = vld [vmem:[%s634_s27] sm:$0x1]  ;;  %562 = vadd.xlane.f32.xlu0 %v561_v18 }
 0x37a   :  { %v636_v19 = vmul.f32 %v635_v15, %v633_v14  ;;  %v675_v20 = vsel %vm408_vm8, %v674_v17, 0.0 }
 0x37b   :  { %676 = vadd.xlane.f32.xlu1 %v675_v20 }
 0x37c   :  { %v637_v21 = vsel %vm408_vm8, %v636_v19, 0.0  ;;  %vm1191_vm8 = vmand %vm1189_vm5, %vm1190_vm6 }
 0x37d   :  { %638 = vadd.xlane.f32.xlu0 %v637_v21 }
 0x381   :  { %801 = vadd.xlane.f32.xlu0 %v800_v26 }
 0x3f8   :  { %v487_v11 = vpop.xlane.xlu1 %486 }
 0x3f9   :  { %v488_v12 = vrot.slane %v487_v11, 4 }
 0x3fa   :  { %v411_v31 = vpop.xlane.xlu0 %410 }
 0x3fb   :  { %v412_v33 = vrot.slane %v411_v31, 4  ;;  %v489_v15 = vadd.f32 %v488_v12, %v487_v11 }
 0x3fd   :  { %v413_v34 = vadd.f32 %v412_v33, %v411_v31  ;;  %v490_v16 = vrot.slane %v489_v15, 2  ;;  %v50_v31 = vld [vmem:[#allocation5 + $0x88] sm:$0xff]  ;;  %v49_v33 = vld [vmem:[#allocation5 + $0x80] sm:$0xff] }
 0x3fe   :  { %v449_v50 = vpop.xlane.xlu0 %448  ;;  %1383 = vmatprep.subr.mxu1 %v50_v31 }
 0x3ff   :  { %v414_v35 = vrot.slane %v413_v34, 2  ;;  %v450_v51 = vrot.slane %v449_v50, 4  ;;  %v491_v18 = vadd.f32 %v490_v16, %v489_v15 }
 0x401   :  { %v415_v36 = vadd.f32 %v414_v35, %v413_v34  ;;  %v451_v54 = vadd.f32 %v450_v51, %v449_v50  ;;  %v492_v21 = vrot.slane %v491_v18, 1  ;;  %v48_v34 = vld [vmem:[#allocation5 + $0x78] sm:$0xff]  ;;  %v47_v35 = vld [vmem:[#allocation5 + $0x70] sm:$0xff] }
 0x403   :  { %v416_v32 = vrot.slane %v415_v36, 1  ;;  %v452_v55 = vrot.slane %v451_v54, 2  ;;  %v493_v25 = vadd.f32 %v492_v21, %v491_v18 }
 0x405   :  { %v417_v37 = vadd.f32 %v416_v32, %v415_v36  ;;  %v453_v57 = vadd.f32 %v452_v55, %v451_v54  ;;  %v525_v36 = vpop.xlane.xlu1 %524 }
 0x406   :  { %v526_v32 = vrot.slane %v525_v36, 4 }
 0x407   :  { %1401 = vpush %v417_v37  ;;  %v454_v60 = vrot.slane %v453_v57, 1 }
 0x409   :  { %v455_v1 = vadd.f32 %v454_v60, %v453_v57 }
 0x424   :  { %v1368_v38 = vpop.f32.mrf.mxu0 }
 0x425   :  { %v1166_v39 = vsub.f32 %v1663_v44, %v1368_v38 }
 0x426   :  { %v787_v40 = vpop.f32.mrf.mxu0 }
 0x427   :  { %v1168_v41 = vmul.f32 %v1166_v39, %v1166_v39  ;;  %v1165_v42 = vsub.f32 %v1673_v47, %v787_v40  ;;  %1373 = vmatprep.mubr.msk.f32.mxu1 %vm135_vm1, %v787_v40  ;;  %v527_v39 = vadd.f32 %v526_v32, %v525_v36 }
 0x428   :  { %1374 = vmatmul.mubr.msk.f32.vlgmr.msra.gmra.mxu1 %vm135_vm1, %v1368_v38 }
 0x429   :  { %v1167_v43 = vmul.f32 %v1165_v42, %v1165_v42  ;;  %v1170_v46 = vsel %vm135_vm1, %v1168_v41, 0.0  ;;  %1384 = vmatpush3.msra.mxu1 %v50_v31  ;;  %v528_v40 = vrot.slane %v527_v39, 2 }
 0x42a   :  { %1385 = vmatprep.subr.mxu1 %v49_v33 }
 0x42b   :  { %v1169_v45 = vsel %vm135_vm1, %v1167_v43, 0.0  ;;  %1386 = vmatpush3.msra.mxu1 %v49_v33  ;;  %v529_v42 = vadd.f32 %v528_v40, %v527_v39 }
 0x42c   :  { %v1171_v48 = vadd.f32 %v1170_v46, %v1169_v45  ;;  %1387 = vmatprep.subr.mxu1 %v48_v34 }
 0x42d   :  { %1388 = vmatpush3.msra.mxu1 %v48_v34  ;;  %v530_v46 = vrot.slane %v529_v42, 1 }
 0x42e   :  { %1172 = vadd.xlane.f32.xlu0 %v1171_v48  ;;  %1389 = vmatprep.subr.mxu1 %v47_v35 }
 0x42f   :  { %1390 = vmatpush3.msra.mxu1 %v47_v35  ;;  %v531_v50 = vadd.f32 %v530_v46, %v529_v42 }
 0x438   :  { %s1733_s28 = spop %1401 }
 0x439   :  { %s422_s29 = sand.u32 2147483647, %s1733_s28  ;;  %s419_s10 = ssub.f32 0.0, %s1733_s28 }
 0x43a   :  { %s423_s30 = ssub.f32 0.0, %s422_s29 }
 0x43b   :  { %s420_s13 = smax.f32 %s1581_s12, %s419_s10 }
 0x43c   :  { %v424_v44 = vstv %s423_s30 }
 0x43d   :  { %v425_v49 = vmul.f32 1.442695, %v424_v44 }
 0x43f   :  { %1470 = vpow2.f32 %v425_v49 }
 0x44c   :  { %v1471_v47 = vpop.eup %1470 }
 0x44d   :  { %1403 = vpush %v1471_v47 }
 0x47e   :  { %s1404_s4 = spop %1403 }
 0x47f   :  { %v428_v52 = vstv %s1404_s4 }
 0x480   :  { %v429_v53 = vadd.f32 1.0, %v428_v52  ;;  %v432_v56 = vmul.f32 -0.5, %v428_v52  ;;  %v435_v59 = vand.u32 2147483647, %v428_v52 }
 0x482   :  { %1472 = vlog2.f32 %v429_v53  ;;  %v433_v58 = vadd.f32 1.0, %v432_v56  ;;  %vm436_vm9 = vcmp.lt.f32.partialorder %v435_v59, 0.0004427343 }
 0x484   :  { %v434_v62 = vmul.f32 %v433_v58, %v428_v52 }
 0x48f   :  { %v1473_v61 = vpop.eup %1472 }
 0x490   :  { %v431_v63 = vmul.f32 0.6931472, %v1473_v61 }
 0x492   :  { %v437_v0 = vsel %vm436_vm9, %v434_v62, %v431_v63  ;;  %vm1198_vm9 = vcmp.eq.s32.totalorder %v1639_v30, 2 }
 0x493   :  { %1405 = vpush %v437_v0 }
 0x494   :  { %1407 = vpush %v455_v1 }
 0x4c4   :  { %s1736_s5 = spop %1405 }
 0x4c5   :  { %s1738_s6 = spop %1407  ;;  %s439_s14 = sadd.f32 %s1736_s5, %s420_s13 }
 0x4c6   :  { %s460_s7 = sand.u32 2147483647, %s1738_s6  ;;  %s457_s11 = ssub.f32 0.0, %s1738_s6 }
 0x4c7   :  { %s461_s8 = ssub.f32 0.0, %s460_s7 }
 0x4c8   :  { %s458_s15 = smax.f32 %s1581_s12, %s457_s11 }
 0x4c9   :  { %v462_v3 = vstv %s461_s8  ;;  %s1750_s16 = sadd.f32 %s458_s15, %s439_s14 }
 0x4ca   :  { %v463_v4 = vmul.f32 1.442695, %v462_v3  ;;  %v563_v3 = vpop.xlane.xlu0 %562 }
 0x4cc   :  { %1474 = vpow2.f32 %v463_v4  ;;  %v564_v4 = vrot.slane %v563_v3, 4 }
 0x4d9   :  { %v1475_v7 = vpop.eup %1474 }
 0x4da   :  { %1409 = vpush %v1475_v7 }
 0x4e8   :  { %v1375_v8 = vpop.f32.mrf.mxu1 }
 0x4e9   :  { %1376 = vmatprep.subr.mxu0 %v1375_v8 }
 0x4ea   :  { %v882_v10 = vpop.f32.mrf.mxu1  ;;  %1377 = vmatpush3.msra.mxu0 %v1375_v8 }
 0x4eb   :  { %1378 = vmatprep.subr.mxu0 %v882_v10 }
 0x4ec   :  { %1379 = vmatpush3.msra.mxu0 %v882_v10  ;;  %v565_v10 = vadd.f32 %v564_v4, %v563_v3 }
 0x4ed   :  { %1381 = vmatmul.mubr.msk.f32.vlgmr.msra.gmra.mxu0 %vm135_vm1, %v1629_v9 }
 0x4ee   :  { %1398 = vmatprep.mubr.msk.f32.mxu0 %vm135_vm1, %v1623_v6  ;;  %v566_v11 = vrot.slane %v565_v10, 2 }
 0x50b   :  { %s1410_s9 = spop %1409 }
 0x50c   :  { %v466_v13 = vstv %s1410_s9 }
 0x50d   :  { %v467_v14 = vadd.f32 1.0, %v466_v13  ;;  %v470_v17 = vmul.f32 -0.5, %v466_v13  ;;  %v473_v20 = vand.u32 2147483647, %v466_v13 }
 0x50f   :  { %1476 = vlog2.f32 %v467_v14  ;;  %v471_v19 = vadd.f32 1.0, %v470_v17  ;;  %vm474_vm10 = vcmp.lt.f32.partialorder %v473_v20, 0.0004427343 }
 0x511   :  { %v472_v23 = vmul.f32 %v471_v19, %v466_v13  ;;  %v567_v13 = vadd.f32 %v566_v11, %v565_v10 }
 0x513   :  { %v568_v16 = vrot.slane %v567_v13, 1 }
 0x515   :  { %v569_v21 = vadd.f32 %v568_v16, %v567_v13 }
 0x51c   :  { %v1477_v22 = vpop.eup %1476 }
 0x51d   :  { %v469_v24 = vmul.f32 0.6931472, %v1477_v22 }
 0x51f   :  { %v475_v6 = vsel %vm474_vm10, %v472_v23, %v469_v24  ;;  %vm1195_vm10 = vmand %vm1189_vm5, %vm1194_vm7 }
 0x520   :  { %1411 = vpush %v475_v6 }
 0x521   :  { %1413 = vpush %v493_v25 }
 0x551   :  { %s1752_s17 = spop %1411 }
 0x552   :  { %s477_s18 = sadd.f32 %s1752_s17, %s1750_s16  ;;  %s1756_s19 = spop %1413 }
 0x553   :  { %s498_s0 = sand.u32 2147483647, %s1756_s19  ;;  %s495_s23 = ssub.f32 0.0, %s1756_s19 }
 0x554   :  { %s499_s20 = ssub.f32 0.0, %s498_s0 }
 0x555   :  { %s496_s24 = smax.f32 %s1581_s12, %s495_s23 }
 0x556   :  { %v500_v26 = vstv %s499_s20  ;;  %s1766_s2 = sadd.f32 %s496_s24, %s477_s18 }
 0x557   :  { %v501_v27 = vmul.f32 1.442695, %v500_v26  ;;  %v601_v26 = vpop.xlane.xlu1 %600 }
 0x559   :  { %1478 = vpow2.f32 %v501_v27  ;;  %v602_v27 = vrot.slane %v601_v26, 4 }
 0x55b   :  { %v603_v33 = vadd.f32 %v602_v27, %v601_v26 }
 0x55d   :  { %v604_v34 = vrot.slane %v603_v33, 2 }
 0x55f   :  { %v605_v36 = vadd.f32 %v604_v34, %v603_v33 }
 0x566   :  { %v1479_v28 = vpop.eup %1478 }
 0x567   :  { %1415 = vpush %v1479_v28 }
 0x598   :  { %s1416_s21 = spop %1415 }
 0x599   :  { %v504_v37 = vstv %s1416_s21 }
 0x59a   :  { %v505_v38 = vadd.f32 1.0, %v504_v37  ;;  %v508_v41 = vmul.f32 -0.5, %v504_v37  ;;  %v511_v45 = vand.u32 2147483647, %v504_v37 }
 0x59c   :  { %1480 = vlog2.f32 %v505_v38  ;;  %v509_v43 = vadd.f32 1.0, %v508_v41  ;;  %vm512_vm11 = vcmp.lt.f32.partialorder %v511_v45, 0.0004427343  ;;  %v606_v38 = vrot.slane %v605_v36, 1 }
 0x59e   :  { %v510_v44 = vmul.f32 %v509_v43, %v504_v37  ;;  %v607_v42 = vadd.f32 %v606_v38, %v605_v36 }
 0x5a9   :  { %v1481_v48 = vpop.eup %1480 }
 0x5aa   :  { %v507_v49 = vmul.f32 0.6931472, %v1481_v48  ;;  %v639_v48 = vpop.xlane.xlu0 %638 }
 0x5ac   :  { %v513_v47 = vsel %vm512_vm11, %v510_v44, %v507_v49  ;;  %v640_v44 = vrot.slane %v639_v48, 4  ;;  %vm1199_vm11 = vmand %vm1189_vm5, %vm1198_vm9 }
 0x5ad   :  { %1417 = vpush %v513_v47  ;;  %v1382_v51 = vpop.f32.mrf.mxu0 }
 0x5ae   :  { %1419 = vpush %v531_v50  ;;  %v969_v52 = vmin.f32 %v1382_v51, 0.0  ;;  %vm967_vm12 = vcmp.gt.f32.partialorder %v1382_v51, 0.0  ;;  %v641_v50 = vadd.f32 %v640_v44, %v639_v48 }
 0x5af   :  { %v957_v53 = vpop.f32.mrf.mxu0 }
 0x5b0   :  { %v972_v54 = vmul.f32 1.442695, %v969_v52  ;;  %v968_v55 = vmin.f32 %v957_v53, 0.0  ;;  %vm966_vm13 = vcmp.gt.f32.partialorder %v957_v53, 0.0 }
 0x5b2   :  { %1482 = vpow2.f32 %v972_v54  ;;  %v970_v56 = vmul.f32 1.442695, %v968_v55 }
 0x5b4   :  { %1484 = vpow2.f32 %v970_v56 }
 0x5bf   :  { %v1483_v57 = vpop.eup %1482 }
 0x5c0   :  { %v1277_v58 = vadd.f32 -1.0, %v1483_v57 }
 0x5c1   :  { %v1485_v59 = vpop.eup %1484 }
 0x5c2   :  { %v1276_v60 = vadd.f32 -1.0, %v1485_v59  ;;  %v977_v61 = vsel %vm967_vm12, %v1382_v51, %v1277_v58  ;;  %v642_v51 = vrot.slane %v641_v50, 2  ;;  %vm1202_vm12 = vcmp.eq.s32.totalorder %v1639_v30, 3 }
 0x5c4   :  { %v976_v62 = vsel %vm966_vm13, %v957_v53, %v1276_v60  ;;  %v643_v53 = vadd.f32 %v642_v51, %v641_v50  ;;  %vm1206_vm13 = vcmp.eq.s32.totalorder %v1639_v30, 4 }
 0x5c5   :  { %1391 = vmatprep.mubr.msk.f32.mxu1 %vm53_vm0, %v976_v62 }
 0x5c6   :  { %1392 = vmatmul.mubr.msk.f32.vlgmr.msra.gmra.mxu1 %vm53_vm0, %v977_v61  ;;  %v644_v58 = vrot.slane %v643_v53, 1 }
 0x5c8   :  { %v645_v4 = vadd.f32 %v644_v58, %v643_v53 }
 0x5de   :  { %s1768_s25 = spop %1417 }
 0x5df   :  { %s515_s26 = sadd.f32 %s1768_s25, %s1766_s2  ;;  %s1772_s27 = spop %1419 }
 0x5e0   :  { %s536_s28 = sand.u32 2147483647, %s1772_s27  ;;  %s533_s4 = ssub.f32 0.0, %s1772_s27 }
 0x5e1   :  { %s537_s29 = ssub.f32 0.0, %s536_s28 }
 0x5e2   :  { %s534_s5 = smax.f32 %s1581_s12, %s533_s4 }
 0x5e3   :  { %v538_v63 = vstv %s537_s29  ;;  %s1780_s6 = sadd.f32 %s534_s5, %s515_s26 }
 0x5e4   :  { %v539_v0 = vmul.f32 1.442695, %v538_v63 }
 0x5e6   :  { %1486 = vpow2.f32 %v539_v0 }
 0x5f3   :  { %v1487_v1 = vpop.eup %1486 }
 0x5f4   :  { %1421 = vpush %v1487_v1 }
 0x625   :  { %s1422_s30 = spop %1421 }
 0x626   :  { %v542_v7 = vstv %s1422_s30 }
 0x627   :  { %v543_v8 = vadd.f32 1.0, %v542_v7  ;;  %v546_v12 = vmul.f32 -0.5, %v542_v7  ;;  %v549_v15 = vand.u32 2147483647, %v542_v7 }
 0x629   :  { %1488 = vlog2.f32 %v543_v8  ;;  %v547_v14 = vadd.f32 1.0, %v546_v12  ;;  %vm550_vm14 = vcmp.lt.f32.partialorder %v549_v15, 0.0004427343 }
 0x62b   :  { %v548_v18 = vmul.f32 %v547_v14, %v542_v7 }
 0x636   :  { %v1489_v17 = vpop.eup %1488 }
 0x637   :  { %v545_v19 = vmul.f32 0.6931472, %v1489_v17 }
 0x639   :  { %v551_v20 = vsel %vm550_vm14, %v548_v18, %v545_v19  ;;  %vm1203_vm14 = vmand %vm1189_vm5, %vm1202_vm12 }
 0x63a   :  { %1423 = vpush %v551_v20 }
 0x63b   :  { %1425 = vpush %v569_v21 }
 0x66b   :  { %s1782_s7 = spop %1423 }
 0x66c   :  { %s553_s8 = sadd.f32 %s1782_s7, %s1780_s6  ;;  %s1786_s9 = spop %1425 }
 0x66d   :  { %s574_s10 = sand.u32 2147483647, %s1786_s9  ;;  %s571_s14 = ssub.f32 0.0, %s1786_s9 }
 0x66e   :  { %s575_s11 = ssub.f32 0.0, %s574_s10 }
 0x66f   :  { %s572_s15 = smax.f32 %s1581_s12, %s571_s14 }
 0x670   :  { %v576_v22 = vstv %s575_s11  ;;  %s1796_s16 = sadd.f32 %s572_s15, %s553_s8 }
 0x671   :  { %v577_v23 = vmul.f32 1.442695, %v576_v22  ;;  %v677_v22 = vpop.xlane.xlu1 %676 }
 0x673   :  { %1490 = vpow2.f32 %v577_v23  ;;  %v678_v23 = vrot.slane %v677_v22, 4 }
 0x680   :  { %v1491_v24 = vpop.eup %1490 }
 0x681   :  { %1427 = vpush %v1491_v24 }
 0x686   :  { %v1393_v6 = vpop.f32.mrf.mxu1 }
 0x687   :  { %1394 = vmatprep.subr.mxu0 %v1393_v6 }
 0x688   :  { %v1050_v25 = vpop.f32.mrf.mxu1  ;;  %1395 = vmatpush3.msra.mxu0 %v1393_v6 }
 0x689   :  { %1396 = vmatprep.subr.mxu0 %v1050_v25 }
 0x68a   :  { %1397 = vmatpush3.msra.mxu0 %v1050_v25  ;;  %v679_v25 = vadd.f32 %v678_v23, %v677_v22 }
 0x68b   :  { %1399 = vmatmul.mubr.msk.f32.vlgmr.msra.gmra.mxu0 %vm135_vm1, %v1629_v9 }
 0x68c   :  { %v680_v26 = vrot.slane %v679_v25, 2 }
 0x6b2   :  { %s1428_s13 = spop %1427 }
 0x6b3   :  { %v580_v28 = vstv %s1428_s13 }
 0x6b4   :  { %v581_v31 = vadd.f32 1.0, %v580_v28  ;;  %v584_v35 = vmul.f32 -0.5, %v580_v28  ;;  %v587_v37 = vand.u32 2147483647, %v580_v28 }
 0x6b6   :  { %1492 = vlog2.f32 %v581_v31  ;;  %v585_v32 = vadd.f32 1.0, %v584_v35  ;;  %vm588_vm15 = vcmp.lt.f32.partialorder %v587_v37, 0.0004427343 }
 0x6b8   :  { %v586_v40 = vmul.f32 %v585_v32, %v580_v28  ;;  %v681_v28 = vadd.f32 %v680_v26, %v679_v25 }
 0x6ba   :  { %v682_v34 = vrot.slane %v681_v28, 1 }
 0x6bc   :  { %v683_v38 = vadd.f32 %v682_v34, %v681_v28 }
 0x6c3   :  { %v1493_v39 = vpop.eup %1492 }
 0x6c4   :  { %v583_v41 = vmul.f32 0.6931472, %v1493_v39 }
 0x6c6   :  { %v589_v9 = vsel %vm588_vm15, %v586_v40, %v583_v41  ;;  %vm1207_vm15 = vmand %vm1189_vm5, %vm1206_vm13 }
 0x6c7   :  { %1429 = vpush %v589_v9  ;;  %v802_v9 = vpop.xlane.xlu0 %801 }
 0x6c8   :  { %1431 = vpush %v607_v42 }
 0x6f8   :  { %s1798_s17 = spop %1429 }
 0x6f9   :  { %s591_s18 = sadd.f32 %s1798_s17, %s1796_s16  ;;  %s1802_s19 = spop %1431 }
 0x6fa   :  { %s612_s0 = sand.u32 2147483647, %s1802_s19  ;;  %s609_s23 = ssub.f32 0.0, %s1802_s19 }
 0x6fb   :  { %s613_s20 = ssub.f32 0.0, %s612_s0 }
 0x6fc   :  { %s610_s24 = smax.f32 %s1581_s12, %s609_s23 }
 0x6fd   :  { %v614_v43 = vstv %s613_s20  ;;  %s1814_s2 = sadd.f32 %s610_s24, %s591_s18 }
 0x6fe   :  { %v615_v45 = vmul.f32 1.442695, %v614_v43  ;;  %v1173_v43 = vpop.xlane.xlu0 %1172 }
 0x6ff   :  { %v1174_v44 = vrot.slane %v1173_v43, 4 }
 0x700   :  { %1494 = vpow2.f32 %v615_v45  ;;  %v803_v45 = vrot.slane %v802_v9, 4 }
 0x701   :  { %v1175_v51 = vadd.f32 %v1174_v44, %v1173_v43 }
 0x70d   :  { %v1495_v46 = vpop.eup %1494 }
 0x70e   :  { %1433 = vpush %v1495_v46 }
 0x73f   :  { %s1434_s21 = spop %1433 }
 0x740   :  { %v618_v49 = vstv %s1434_s21 }
 0x741   :  { %v619_v47 = vadd.f32 1.0, %v618_v49  ;;  %v622_v52 = vmul.f32 -0.5, %v618_v49  ;;  %v625_v56 = vand.u32 2147483647, %v618_v49 }
 0x743   :  { %1496 = vlog2.f32 %v619_v47  ;;  %v623_v54 = vadd.f32 1.0, %v622_v52  ;;  %vm626_vm1 = vcmp.lt.f32.partialorder %v625_v56, 0.0004427343  ;;  %v804_v47 = vadd.f32 %v803_v45, %v802_v9 }
 0x745   :  { %v624_v63 = vmul.f32 %v623_v54, %v618_v49  ;;  %v805_v52 = vrot.slane %v804_v47, 2  ;;  %v1176_v54 = vrot.slane %v1175_v51, 2 }
 0x747   :  { %v806_v56 = vadd.f32 %v805_v52, %v804_v47  ;;  %v1177_v58 = vadd.f32 %v1176_v54, %v1175_v51 }
 0x74b   :  { %v1400_v55 = vpop.f32.mrf.mxu0 }
 0x74c   :  { %v1137_v57 = vmin.f32 %v1400_v55, 0.0  ;;  %vm1135_vm2 = vcmp.gt.f32.partialorder %v1400_v55, 0.0 }
 0x74d   :  { %v1125_v59 = vpop.f32.mrf.mxu0 }
 0x74e   :  { %v1140_v61 = vmul.f32 1.442695, %v1137_v57  ;;  %v1136_v62 = vmin.f32 %v1125_v59, 0.0  ;;  %vm1134_vm3 = vcmp.gt.f32.partialorder %v1125_v59, 0.0 }
 0x750   :  { %v1497_v60 = vpop.eup %1496  ;;  %1498 = vpow2.f32 %v1140_v61  ;;  %v1138_v1 = vmul.f32 1.442695, %v1136_v62  ;;  %v807_v61 = vrot.slane %v806_v56, 1 }
 0x751   :  { %v621_v0 = vmul.f32 0.6931472, %v1497_v60 }
 0x752   :  { %1500 = vpow2.f32 %v1138_v1 }
 0x753   :  { %v627_v3 = vsel %vm626_vm1, %v624_v63, %v621_v0 }
 0x754   :  { %1435 = vpush %v627_v3  ;;  %v1178_v3 = vrot.slane %v1177_v58, 1 }
 0x755   :  { %1437 = vpush %v645_v4 }
 0x75d   :  { %v1499_v7 = vpop.eup %1498 }
 0x75e   :  { %v1283_v8 = vadd.f32 -1.0, %v1499_v7  ;;  %v808_v7 = vadd.f32 %v807_v61, %v806_v56 }
 0x75f   :  { %v1501_v10 = vpop.eup %1500 }
 0x760   :  { %v1145_v11 = vsel %vm1135_vm2, %v1400_v55, %v1283_v8  ;;  %v1282_v12 = vadd.f32 -1.0, %v1501_v10  ;;  %v1179_v10 = vadd.f32 %v1178_v3, %v1177_v58 }
 0x761   :  { %v1147_v13 = vsub.f32 %v1619_v5, %v1145_v11 }
 0x762   :  { %v1144_v14 = vsel %vm1134_vm3, %v1125_v59, %v1282_v12 }
 0x763   :  { %v1146_v15 = vsub.f32 %v1615_v2, %v1144_v14  ;;  %v1149_v16 = vmul.f32 %v1147_v13, %v1147_v13 }
 0x765   :  { %v1148_v17 = vmul.f32 %v1146_v15, %v1146_v15  ;;  %v1151_v18 = vsel %vm53_vm0, %v1149_v16, 0.0 }
 0x767   :  { %v1150_v19 = vsel %vm53_vm0, %v1148_v17, 0.0 }
 0x768   :  { %v1152_v20 = vadd.f32 %v1151_v18, %v1150_v19 }
 0x76a   :  { %1153 = vadd.xlane.f32.xlu1 %v1152_v20 }
 0x785   :  { %s1816_s25 = spop %1435 }
 0x786   :  { %s629_s26 = sadd.f32 %s1816_s25, %s1814_s2  ;;  %s1820_s27 = spop %1437 }
 0x787   :  { %s650_s28 = sand.u32 2147483647, %s1820_s27  ;;  %s647_s4 = ssub.f32 0.0, %s1820_s27 }
 0x788   :  { %s651_s29 = ssub.f32 0.0, %s650_s28 }
 0x789   :  { %s648_s5 = smax.f32 %s1581_s12, %s647_s4 }
 0x78a   :  { %v652_v2 = vstv %s651_s29  ;;  %s1828_s6 = sadd.f32 %s648_s5, %s629_s26  ;;  %s1582_s26 = smov [#allocation8]  }
 0x78b   :  { %v653_v5 = vmul.f32 1.442695, %v652_v2  ;;  %s1216_s27 = sshll.u32 %s1582_s26, 4  ;;  %s1217_s27 = int_to_ptr.vmem [resolvable:$true] %s1216_s27 }
 0x78c   :  { %s1550_s29 = scalar_lea.vmem %s1217_s27, 384  ;;  %p1555_p11 = scmp.lt.s32.totalorder %s1217_s27, %s1217_s27 }
 0x78d   :  { %1502 = vpow2.f32 %v653_v5  ;;  %p1551_p10 = scmp.ne.s32.totalorder %s1217_s27, %s1550_s29  ;;  %p1556_p12 = scmp.lt.s32.totalorder %s1550_s29, %s1550_s29 }
 0x78f   :  { %p1557_p13 = por %p1556_p12, %p1555_p11 }
 0x791   :  { %p1558_p0 = pnand %p1557_p13, %p1551_p10 }
 0x79a   :  { %v1503_v21 = vpop.eup %1502 }
 0x79b   :  { %1439 = vpush %v1503_v21 }
 0x7cc   :  { %s1440_s30 = spop %1439 }
 0x7cd   :  { %v656_v24 = vstv %s1440_s30 }
 0x7ce   :  { %v657_v6 = vadd.f32 1.0, %v656_v24  ;;  %v660_v27 = vmul.f32 -0.5, %v656_v24  ;;  %v663_v33 = vand.u32 2147483647, %v656_v24 }
 0x7d0   :  { %1504 = vlog2.f32 %v657_v6  ;;  %v661_v31 = vadd.f32 1.0, %v660_v27  ;;  %vm664_vm0 = vcmp.lt.f32.partialorder %v663_v33, 0.0004427343 }
 0x7d2   :  { %v662_v36 = vmul.f32 %v661_v31, %v656_v24 }
 0x7dd   :  { %v1505_v35 = vpop.eup %1504 }
 0x7de   :  { %v659_v32 = vmul.f32 0.6931472, %v1505_v35 }
 0x7e0   :  { %v665_v37 = vsel %vm664_vm0, %v662_v36, %v659_v32 }
 0x7e1   :  { %1441 = vpush %v665_v37 }
 0x7e2   :  { %1443 = vpush %v683_v38 }
 0x7f3   :  { %v1154_v42 = vpop.xlane.xlu1 %1153 }
 0x7f4   :  { %v1155_v46 = vrot.slane %v1154_v42, 4 }
 0x7f6   :  { %v1156_v50 = vadd.f32 %v1155_v46, %v1154_v42 }
 0x7f8   :  { %v1157_v53 = vrot.slane %v1156_v50, 2 }
 0x7fa   :  { %v1158_v57 = vadd.f32 %v1157_v53, %v1156_v50 }
 0x7fc   :  { %v1159_v63 = vrot.slane %v1158_v57, 1 }
 0x7fe   :  { %v1160_v8 = vadd.f32 %v1159_v63, %v1158_v57 }
 0x812   :  { %s1830_s7 = spop %1441 }
 0x813   :  { %s667_s8 = sadd.f32 %s1830_s7, %s1828_s6  ;;  %s1834_s9 = spop %1443 }
 0x814   :  { %s688_s10 = sand.u32 2147483647, %s1834_s9  ;;  %s685_s14 = ssub.f32 0.0, %s1834_s9 }
 0x815   :  { %s689_s11 = ssub.f32 0.0, %s688_s10 }
 0x816   :  { %s686_s15 = smax.f32 %s1581_s12, %s685_s14 }
 0x817   :  { %v690_v39 = vstv %s689_s11  ;;  %s687_s16 = sadd.f32 %s686_s15, %s667_s8 }
 0x818   :  { %v691_v40 = vmul.f32 1.442695, %v690_v39 }
 0x81a   :  { %1506 = vpow2.f32 %v691_v40 }
 0x827   :  { %v1507_v41 = vpop.eup %1506 }
 0x828   :  { %1445 = vpush %v1507_v41 }
 0x859   :  { %s1446_s13 = spop %1445 }
 0x85a   :  { %v694_v48 = vstv %s1446_s13 }
 0x85b   :  { %v695_v49 = vadd.f32 1.0, %v694_v48  ;;  %v698_v55 = vmul.f32 -0.5, %v694_v48  ;;  %v701_v60 = vand.u32 2147483647, %v694_v48 }
 0x85d   :  { %1508 = vlog2.f32 %v695_v49  ;;  %v699_v59 = vadd.f32 1.0, %v698_v55  ;;  %vm702_vm4 = vcmp.lt.f32.partialorder %v701_v60, 0.0004427343 }
 0x85f   :  { %v700_v0 = vmul.f32 %v699_v59, %v694_v48 }
 0x86a   :  { %v1509_v62 = vpop.eup %1508 }
 0x86b   :  { %v697_v1 = vmul.f32 0.6931472, %v1509_v62 }
 0x86d   :  { %v703_v4 = vsel %vm702_vm4, %v700_v0, %v697_v1 }
 0x86e   :  { %1447 = vpush %v703_v4 }
 0x86f   :  { %1449 = vpush %v808_v7 }
 0x870   :  { %1451 = vpush %v1160_v8 }
 0x871   :  { %1453 = vpush %v1179_v10 }
 0x89f   :  { %s1448_s17 = spop %1447 }
 0x8a0   :  { %s705_s18 = sadd.f32 %s1448_s17, %s687_s16  ;;  %s1450_s19 = spop %1449 }
 0x8a1   :  { %s1452_s0 = spop %1451  ;;  %v1204_v17 = vstv %s1450_s19 }
 0x8a2   :  { %s1185_s20 = smul.f32 0.1, %s705_s18  ;;  %s1454_s21 = spop %1453  ;;  %v1196_v11 = vstv %s705_s18 }
 0x8a3   :  { %s1164_s23 = smul.f32 0.001953125, %s1452_s0 }
 0x8a4   :  { %s1183_s12 = smul.f32 0.00390625, %s1454_s21 }
 0x8a5   :  { %s1186_s24 = sadd.f32 %s1185_s20, %s1164_s23  ;;  %v1192_v12 = vstv %s1164_s23 }
 0x8a6   :  { %v1193_v13 = vsel %vm1191_vm8, %v1192_v12, 0.0  ;;  %s1184_s2 = smul.f32 0.5, %s1183_s12 }
 0x8a7   :  { %v1197_v14 = vsel %vm1195_vm10, %v1196_v11, %v1193_v13 }
 0x8a8   :  { %s1187_s25 = sadd.f32 %s1186_s24, %s1184_s2  ;;  %v1200_v15 = vstv %s1184_s2 }
 0x8a9   :  { %v1201_v16 = vsel %vm1199_vm11, %v1200_v15, %v1197_v14 }
 0x8aa   :  { %s1188_s28 = sadd.f32 %s1450_s19, %s1187_s25  ;;  %v1205_v18 = vsel %vm1203_vm14, %v1204_v17, %v1201_v16 }
 0x8ac   :  { %v1208_v19 = vstv %s1188_s28 }
 0x8ad   :  { %v1209_v20 = vsel %vm1207_vm15, %v1208_v19, %v1205_v18 }
 0x8ae   :  { %1210 = vst [vmem:[#allocation8 + $0x10] sm:$0xff] %v1209_v20 }
 0x8af   :  { %1561 = shalt.err (!%p1558_p0)
}
 0x8b0   :  { %1222 = dma.vmem_to_hbm [thread:$0]  %s1217_s27, 384, %s1866_s3, [#allocation7], %s1579_s1, %s1579_s1, %s1580_s22  }
 0x8b1   :  { %1574 = dma.done.wait [#allocation7], 384  }
 0x8b2   :  { %1575 = vsyncadd [#allocation7], 4294966912 }
 0x8b3   :  { %1226 = vsyncpa [#allocation6], 1 }
 0x8b4   :  { %1227 = vsyncpa [#allocation7], 1 }

</bundles_post_ra>
